<compile_context>
chip_gen: v6e
topology: v6e:2x2x1
jax: 0.10.0
libtpu: 0.0.40
codegen_flags: <defaults>
</compile_context>

<pallas_src>
import jax
import jax.numpy as jnp
from jax.experimental import pallas as pl
from jax.experimental.pallas import tpu as pltpu


def _round_up(a, m):
    return (a + m - 1) // m * m


def _pick_tb(B, d_phi, hid_pad, d_loc):
    """Largest batch tile (multiple of 16) whose double-buffered working set
    fits a conservative 12 MiB VMEM budget (v5e scoped default is 16 MiB;
    v6e/v7x default to 32 MiB). Prefers a tile that divides B exactly so the
    big x slab never needs a wrapper-side jnp.pad."""
    budget = 12 << 20
    # double-buffered: x tile (f32) + out tile (bf16) + l tile (f32)
    per_row = 2 * (d_phi * 4 + hid_pad * 2 + d_loc * 4)
    cap = (budget // per_row) // 16 * 16
    cap = max(16, min(1024, cap))
    if B <= cap:
        return _round_up(B, 16)
    for tb in range(cap, 15, -16):
        if B % tb == 0:
            return tb
    return cap  # ragged tail handled by Pallas partial-block masking


def _glimpse_kernel(x_ref, l_ref,
                    w1_ref, b1_ref,
                    w2_ref, b2_ref,
                    w3p_ref, w4p_ref, b34_ref,
                    o_ref):
    # fc1 + relu ("what" branch, stage 1): x tile is read from HBM as f32 and
    # cast to bf16 in-register (no separate XLA convert pass over x); MXU
    # accumulates in f32.
    x_bf = x_ref[...].astype(jnp.bfloat16)
    phi_out = jnp.maximum(
        jnp.dot(x_bf, w1_ref[...], preferred_element_type=jnp.float32)
        + b1_ref[...], 0.0)                                   # (tb, h_g) f32

    # fc2 + relu ("where" branch, stage 1): K=d_loc(=2) matmul done on the
    # VPU as broadcast FMAs instead of a >98%-padding MXU pass.
    l = l_ref[...]                                            # (tb, d_loc) f32
    w2 = w2_ref[...]                                          # (d_loc, h_l) f32
    acc = b2_ref[...]                                         # (1, h_l)
    for j in range(l.shape[1]):                               # unrolled at trace
        acc = acc + l[:, j:j + 1] * w2[j:j + 1, :]
    l_out = jnp.maximum(acc, 0.0)                             # (tb, h_l) f32

    # fused fc3/fc4 (stage 2), split per branch so there is no lane-offset
    # concatenate (avoids an XLU relayout each grid step). Weight columns are
    # zero-padded to 128 lanes for unmasked output stores.
    out = (jnp.dot(phi_out, w3p_ref[...], preferred_element_type=jnp.float32)
           + jnp.dot(l_out, w4p_ref[...], preferred_element_type=jnp.float32)
           + b34_ref[...])
    o_ref[...] = jnp.maximum(out, 0.0).astype(o_ref.dtype)    # (tb, HID_PAD) bf16


def glimpse_network_forward(x, l_t_prev, params):
    """x: (B, H, W, C) float32; l_t_prev: (B, 2) float32. Returns (B, h_g+h_l) f32."""
    B = x.shape[0]
    x_flat = x.reshape(B, -1)                   # glue: flatten like exnn.Linear
    l_flat = l_t_prev.reshape(B, -1)

    w1, b1, w2, b2, w3, b3, w4, b4 = params
    d_phi = x_flat.shape[1]
    d_loc = l_flat.shape[1]
    h_g = w1.shape[1]
    h_l = w2.shape[1]
    hidden = w3.shape[1]                        # = h_g + h_l

    # --- stage-2 fusion + lane-dense padding (tiny one-time work) ---
    HID_PAD = 128 * pl.cdiv(hidden, 128)
    lane_pad = HID_PAD - hidden
    w3p = jnp.pad(w3, ((0, 0), (0, lane_pad)))                # (h_g, HID_PAD)
    w4p = jnp.pad(w4, ((0, 0), (0, lane_pad)))                # (h_l, HID_PAD)
    b34 = jnp.pad(b3 + b4, ((0, 0), (0, lane_pad)))           # (1, HID_PAD)

    # Only the (tiny) fc1 weight is pre-cast to bf16; x itself is NOT.
    w1_bf = w1.astype(jnp.bfloat16)

    # --- batch tiling ---
    tb = _pick_tb(B, d_phi, HID_PAD, d_loc)
    grid_b = pl.cdiv(B, tb)
    if B < tb:
        # Single tile smaller than the block: pad the (small) batch slab.
        x_flat = jnp.pad(x_flat, ((0, tb - B), (0, 0)))
        l_flat = jnp.pad(l_flat, ((0, tb - B), (0, 0)))
    # else: any ragged last tile (B % tb) is handled by Pallas partial-block
    # masking -- no whole-array jnp.pad over x.
    B_arr = x_flat.shape[0]

    resident = lambda i: (0, 0)                 # weights stay in VMEM across steps

    out = pl.pallas_call(
        _glimpse_kernel,
        out_shape=jax.ShapeDtypeStruct((B_arr, HID_PAD), jnp.bfloat16),
        grid_spec=pltpu.PrefetchScalarGridSpec(
            num_scalar_prefetch=0,
            grid=(grid_b,),
            in_specs=[
                pl.BlockSpec((tb, d_phi), lambda i: (i, 0)),   # x tile (f32)
                pl.BlockSpec((tb, d_loc), lambda i: (i, 0)),   # l tile
                pl.BlockSpec((d_phi, h_g), resident),          # w1 (bf16)
                pl.BlockSpec((1, h_g), resident),              # b1
                pl.BlockSpec((d_loc, h_l), resident),          # w2
                pl.BlockSpec((1, h_l), resident),              # b2
                pl.BlockSpec((h_g, HID_PAD), resident),        # w3 (padded)
                pl.BlockSpec((h_l, HID_PAD), resident),        # w4 (padded)
                pl.BlockSpec((1, HID_PAD), resident),          # b3 + b4 (padded)
            ],
            out_specs=pl.BlockSpec((tb, HID_PAD), lambda i: (i, 0)),
        ),
        # On v7x, use pltpu.CORE_PARALLEL on this axis (when grid_b is a
        # multiple of the core count) to split batch tiles across both TCs.
        compiler_params=pltpu.CompilerParams(
            dimension_semantics=("parallel",)),
    )(x_flat, l_flat, w1_bf, b1, w2, b2, w3p, w4p, b34)

    # Slice off batch padding / lane padding; return f32 to match the module.
    return out[:B, :hidden].astype(jnp.float32)


def init_params(key, d_phi, d_loc, h_g, h_l):
    """Deterministic synthetic parameter init (same role as exnn.Linear)."""
    hidden = h_g + h_l
    keys = jax.random.split(key, 8)

    def lin(kw, kb, fan_in, fan_out):
        bound = 1.0 / jnp.sqrt(jnp.float32(fan_in))
        w = jax.random.uniform(kw, (fan_in, fan_out), jnp.float32, -bound, bound)
        b = jax.random.uniform(kb, (1, fan_out), jnp.float32, -bound, bound)
        return w, b

    w1, b1 = lin(keys[0], keys[1], d_phi, h_g)      # fc1: phi -> h_g
    w2, b2 = lin(keys[2], keys[3], d_loc, h_l)      # fc2: loc -> h_l
    w3, b3 = lin(keys[4], keys[5], h_g, hidden)     # fc3: h_g -> h_g + h_l
    w4, b4 = lin(keys[6], keys[7], h_l, hidden)     # fc4: h_l -> h_g + h_l
    return (w1, b1, w2, b2, w3, b3, w4, b4)


def _reference(x, l_t_prev, params):
    """Pure-JAX f32 reference of the module forward."""
    w1, b1, w2, b2, w3, b3, w4, b4 = params
    B = x.shape[0]
    xf = x.reshape(B, -1)
    lf = l_t_prev.reshape(B, -1)
    phi = jax.nn.relu(xf @ w1 + b1)
    lo = jax.nn.relu(lf @ w2 + b2)
    return jax.nn.relu((phi @ w3 + b3) + (lo @ w4 + b4))


if __name__ == "__main__":
    # Small shapes: B=2, glimpse retina output interpreted as (B, H, W, C).
    B, H, W, C = 2, 16, 16, 4
    h_g, h_l = 32, 16
    d_phi = H * W * C
    d_loc = 2

    key = jax.random.PRNGKey(0)
    kx, kl, kp = jax.random.split(key, 3)

    x = jax.random.normal(kx, (B, H, W, C), jnp.float32)
    l_t_prev = jax.random.uniform(kl, (B, 2), jnp.float32, -1.0, 1.0)
    params = init_params(kp, d_phi, d_loc, h_g, h_l)

    g_t = glimpse_network_forward(x, l_t_prev, params)
    g_t = jax.block_until_ready(g_t)

    ref = _reference(x, l_t_prev, params)
    assert g_t.shape == (B, h_g + h_l)
    # fc1 runs with bf16 operands (f32 accumulation) and the output is stored
    # as bf16, so compare against the f32 reference with a tolerance covering
    # both roundings.
    assert jnp.allclose(g_t, ref, atol=2e-2, rtol=2e-2), (
        float(jnp.max(jnp.abs(g_t - ref))))

    print("KERNEL_OK")
</pallas_src>

<mosaic_0001>
module attributes {stable_mosaic.version = 11 : i64} {
  func.func @_glimpse_kernel(%arg0: i32, %arg1: memref<16x1024xf32, #tpu.memory_space<vmem>>, %arg2: memref<16x2xf32, #tpu.memory_space<vmem>>, %arg3: memref<1024x32xbf16, #tpu.memory_space<vmem>>, %arg4: memref<1x32xf32, #tpu.memory_space<vmem>>, %arg5: memref<2x16xf32, #tpu.memory_space<vmem>>, %arg6: memref<1x16xf32, #tpu.memory_space<vmem>>, %arg7: memref<32x128xf32, #tpu.memory_space<vmem>>, %arg8: memref<16x128xf32, #tpu.memory_space<vmem>>, %arg9: memref<1x128xf32, #tpu.memory_space<vmem>>, %arg10: memref<16x128xbf16, #tpu.memory_space<vmem>>) attributes {dimension_semantics = [#tpu.dimension_semantics<parallel>], iteration_bounds = array<i64: 1>, scalar_prefetch = 0 : i64, scratch_operands = 0 : i64, tpu.core_type = #tpu.core_type<tc>, window_params = [{transform_indices = @transform_0, window_bounds = array<i64: 16, 1024>}, {transform_indices = @transform_1, window_bounds = array<i64: 16, 2>}, {pipeline_mode = #tpu.pipeline_mode<synchronous>, transform_indices = @transform_2, window_bounds = array<i64: 1024, 32>}, {pipeline_mode = #tpu.pipeline_mode<synchronous>, transform_indices = @transform_3, window_bounds = array<i64: 1, 32>}, {pipeline_mode = #tpu.pipeline_mode<synchronous>, transform_indices = @transform_4, window_bounds = array<i64: 2, 16>}, {pipeline_mode = #tpu.pipeline_mode<synchronous>, transform_indices = @transform_5, window_bounds = array<i64: 1, 16>}, {pipeline_mode = #tpu.pipeline_mode<synchronous>, transform_indices = @transform_6, window_bounds = array<i64: 32, 128>}, {pipeline_mode = #tpu.pipeline_mode<synchronous>, transform_indices = @transform_7, window_bounds = array<i64: 16, 128>}, {pipeline_mode = #tpu.pipeline_mode<synchronous>, transform_indices = @transform_8, window_bounds = array<i64: 1, 128>}, {transform_indices = @transform_9, window_bounds = array<i64: 16, 128>}]} {
    %c0 = arith.constant 0 : index
    %c0_0 = arith.constant 0 : index
    %0 = vector.load %arg1[%c0, %c0_0] : memref<16x1024xf32, #tpu.memory_space<vmem>>, vector<16x1024xf32>
    %1 = arith.truncf %0 : vector<16x1024xf32> to vector<16x1024xbf16>
    %c0_1 = arith.constant 0 : index
    %c0_2 = arith.constant 0 : index
    %2 = vector.load %arg3[%c0_1, %c0_2] : memref<1024x32xbf16, #tpu.memory_space<vmem>>, vector<1024x32xbf16>
    %cst = arith.constant dense<0.000000e+00> : vector<16x32xf32>
    %3 = tpu.matmul %1, %2, %cst {dimension_numbers = #tpu.dot_dimension_numbers<[1], [0], [0], [1], [0, 0, 1, 1], [], []>} : vector<16x1024xbf16>, vector<1024x32xbf16>, vector<16x32xf32> -> vector<16x32xf32>
    %c0_3 = arith.constant 0 : index
    %c0_4 = arith.constant 0 : index
    %4 = vector.load %arg4[%c0_3, %c0_4] : memref<1x32xf32, #tpu.memory_space<vmem>>, vector<1x32xf32>
    %5 = vector.broadcast %4 : vector<1x32xf32> to vector<16x32xf32>
    %6 = arith.addf %3, %5 : vector<16x32xf32>
    %cst_5 = arith.constant 0.000000e+00 : f32
    %7 = vector.broadcast %cst_5 : f32 to vector<16x32xf32>
    %8 = arith.maximumf %6, %7 : vector<16x32xf32>
    %c0_6 = arith.constant 0 : index
    %c0_7 = arith.constant 0 : index
    %9 = vector.load %arg2[%c0_6, %c0_7] : memref<16x2xf32, #tpu.memory_space<vmem>>, vector<16x2xf32>
    %c0_8 = arith.constant 0 : index
    %c0_9 = arith.constant 0 : index
    %10 = vector.load %arg5[%c0_8, %c0_9] : memref<2x16xf32, #tpu.memory_space<vmem>>, vector<2x16xf32>
    %c0_10 = arith.constant 0 : index
    %c0_11 = arith.constant 0 : index
    %11 = vector.load %arg6[%c0_10, %c0_11] : memref<1x16xf32, #tpu.memory_space<vmem>>, vector<1x16xf32>
    %12 = vector.extract_strided_slice %9 {offsets = [0, 0], sizes = [16, 1], strides = [1, 1]} : vector<16x2xf32> to vector<16x1xf32>
    %13 = vector.extract_strided_slice %10 {offsets = [0, 0], sizes = [1, 16], strides = [1, 1]} : vector<2x16xf32> to vector<1x16xf32>
    %14 = vector.broadcast %12 : vector<16x1xf32> to vector<16x16xf32>
    %15 = vector.broadcast %13 : vector<1x16xf32> to vector<16x16xf32>
    %16 = arith.mulf %14, %15 : vector<16x16xf32>
    %17 = vector.broadcast %11 : vector<1x16xf32> to vector<16x16xf32>
    %18 = arith.addf %17, %16 : vector<16x16xf32>
    %19 = vector.extract_strided_slice %9 {offsets = [0, 1], sizes = [16, 1], strides = [1, 1]} : vector<16x2xf32> to vector<16x1xf32>
    %20 = vector.extract_strided_slice %10 {offsets = [1, 0], sizes = [1, 16], strides = [1, 1]} : vector<2x16xf32> to vector<1x16xf32>
    %21 = vector.broadcast %19 : vector<16x1xf32> to vector<16x16xf32>
    %22 = vector.broadcast %20 : vector<1x16xf32> to vector<16x16xf32>
    %23 = arith.mulf %21, %22 : vector<16x16xf32>
    %24 = arith.addf %18, %23 : vector<16x16xf32>
    %cst_12 = arith.constant 0.000000e+00 : f32
    %25 = vector.broadcast %cst_12 : f32 to vector<16x16xf32>
    %26 = arith.maximumf %24, %25 : vector<16x16xf32>
    %c0_13 = arith.constant 0 : index
    %c0_14 = arith.constant 0 : index
    %27 = vector.load %arg7[%c0_13, %c0_14] : memref<32x128xf32, #tpu.memory_space<vmem>>, vector<32x128xf32>
    %cst_15 = arith.constant dense<0.000000e+00> : vector<16x128xf32>
    %28 = tpu.matmul %8, %27, %cst_15 {dimension_numbers = #tpu.dot_dimension_numbers<[1], [0], [0], [1], [0, 0, 1, 1], [], []>} : vector<16x32xf32>, vector<32x128xf32>, vector<16x128xf32> -> vector<16x128xf32>
    %c0_16 = arith.constant 0 : index
    %c0_17 = arith.constant 0 : index
    %29 = vector.load %arg8[%c0_16, %c0_17] : memref<16x128xf32, #tpu.memory_space<vmem>>, vector<16x128xf32>
    %cst_18 = arith.constant dense<0.000000e+00> : vector<16x128xf32>
    %30 = tpu.matmul %26, %29, %cst_18 {dimension_numbers = #tpu.dot_dimension_numbers<[1], [0], [0], [1], [0, 0, 1, 1], [], []>} : vector<16x16xf32>, vector<16x128xf32>, vector<16x128xf32> -> vector<16x128xf32>
    %31 = arith.addf %28, %30 : vector<16x128xf32>
    %c0_19 = arith.constant 0 : index
    %c0_20 = arith.constant 0 : index
    %32 = vector.load %arg9[%c0_19, %c0_20] : memref<1x128xf32, #tpu.memory_space<vmem>>, vector<1x128xf32>
    %33 = vector.broadcast %32 : vector<1x128xf32> to vector<16x128xf32>
    %34 = arith.addf %31, %33 : vector<16x128xf32>
    %cst_21 = arith.constant 0.000000e+00 : f32
    %35 = vector.broadcast %cst_21 : f32 to vector<16x128xf32>
    %36 = arith.maximumf %34, %35 : vector<16x128xf32>
    %37 = arith.truncf %36 : vector<16x128xf32> to vector<16x128xbf16>
    %c0_22 = arith.constant 0 : index
    %c0_23 = arith.constant 0 : index
    %38 = vector.load %arg10[%c0_22, %c0_23] : memref<16x128xbf16, #tpu.memory_space<vmem>>, vector<16x128xbf16>
    tpu.vector_store %arg10[%c0_22, %c0_23], %37 {strides = array<i32>} : memref<16x128xbf16, #tpu.memory_space<vmem>>, vector<16x128xbf16>,
    return
  }
  func.func @transform_0(%arg0: i32) -> (i32, i32) {
    %c0_i32 = arith.constant 0 : i32
    %c0_i32_0 = arith.constant 0 : i32
    return %arg0, %c0_i32 : i32, i32
  }
  func.func @transform_1(%arg0: i32) -> (i32, i32) {
    %c0_i32 = arith.constant 0 : i32
    %c0_i32_0 = arith.constant 0 : i32
    return %arg0, %c0_i32 : i32, i32
  }
  func.func @transform_2(%arg0: i32) -> (i32, i32) {
    %c0_i32 = arith.constant 0 : i32
    %c0_i32_0 = arith.constant 0 : i32
    %c0_i32_1 = arith.constant 0 : i32
    return %c0_i32, %c0_i32_0 : i32, i32
  }
  func.func @transform_3(%arg0: i32) -> (i32, i32) {
    %c0_i32 = arith.constant 0 : i32
    %c0_i32_0 = arith.constant 0 : i32
    %c0_i32_1 = arith.constant 0 : i32
    return %c0_i32, %c0_i32_0 : i32, i32
  }
  func.func @transform_4(%arg0: i32) -> (i32, i32) {
    %c0_i32 = arith.constant 0 : i32
    %c0_i32_0 = arith.constant 0 : i32
    %c0_i32_1 = arith.constant 0 : i32
    return %c0_i32, %c0_i32_0 : i32, i32
  }
  func.func @transform_5(%arg0: i32) -> (i32, i32) {
    %c0_i32 = arith.constant 0 : i32
    %c0_i32_0 = arith.constant 0 : i32
    %c0_i32_1 = arith.constant 0 : i32
    return %c0_i32, %c0_i32_0 : i32, i32
  }
  func.func @transform_6(%arg0: i32) -> (i32, i32) {
    %c0_i32 = arith.constant 0 : i32
    %c0_i32_0 = arith.constant 0 : i32
    %c0_i32_1 = arith.constant 0 : i32
    return %c0_i32, %c0_i32_0 : i32, i32
  }
  func.func @transform_7(%arg0: i32) -> (i32, i32) {
    %c0_i32 = arith.constant 0 : i32
    %c0_i32_0 = arith.constant 0 : i32
    %c0_i32_1 = arith.constant 0 : i32
    return %c0_i32, %c0_i32_0 : i32, i32
  }
  func.func @transform_8(%arg0: i32) -> (i32, i32) {
    %c0_i32 = arith.constant 0 : i32
    %c0_i32_0 = arith.constant 0 : i32
    %c0_i32_1 = arith.constant 0 : i32
    return %c0_i32, %c0_i32_0 : i32, i32
  }
  func.func @transform_9(%arg0: i32) -> (i32, i32) {
    %c0_i32 = arith.constant 0 : i32
    %c0_i32_0 = arith.constant 0 : i32
    return %arg0, %c0_i32 : i32, i32
  }
}

</mosaic_0001>

<bundles_post_ra>
// kernel: tpu_custom_call.1
= control target key start
LH: loop header
LB: loop body
LE: loop exit
PB: predicated region body
PF: predicated region fallthrough
CT: control target
= control target key end

     0   :  { %v1286_v2 = vmov 0   ;;  %v1287_v4 = vmov 1   ;;  %s1622_s0 = inlined_call_operand.vmem [shape: f32[16,1024], index: 0, kind: input, shape index: {}]   ;;  %s1623_s1 = inlined_call_operand.vmem [shape: f32[16,2], index: 1, kind: input, shape index: {}]   ;;  %s1624_s2 = inlined_call_operand.vmem [shape: bf16[1024,32], index: 2, kind: input, shape index: {}]   ;;  %s1625_s3 = inlined_call_operand.vmem [shape: f32[1,32], index: 3, kind: input, shape index: {}]   ;;  %s1626_s4 = inlined_call_operand.vmem [shape: f32[2,16], index: 4, kind: input, shape index: {}]   ;;  %s1627_s5 = inlined_call_operand.vmem [shape: f32[1,16], index: 5, kind: input, shape index: {}]   ;;  %s1628_s6 = inlined_call_operand.vmem [shape: f32[32,128], index: 6, kind: input, shape index: {}]   ;;  %s1629_s7 = inlined_call_operand.vmem [shape: f32[16,128], index: 7, kind: input, shape index: {}]   ;;  %s1630_s8 = inlined_call_operand.vmem [shape: f32[1,128], index: 8, kind: input, shape index: {}]   ;;  %s1631_s9 = inlined_call_operand.hbm [shape: bf16[16,128], index: 9, kind: output, shape index: {}]  }
   0x1   :  { %v1200_v0 = vld [vmem:[%s1624_s2 + $0x78] sm:$0xff]   ;;  %1197 = vset.pattern.permute.xlu0 %v1286_v2  ;;  %1198 = vset.pattern.permute.xlu1 %v1287_v4  ;;  %v1204_v6 = vld [vmem:[%s1624_s2 + $0x70] sm:$0xff]   ;;  %v1208_v10 = vld [vmem:[%s1624_s2 + $0x68] sm:$0xff]  }
   0x2   :  { %v1201_v1 = vld [vmem:[%s1624_s2 + $0xf8] sm:$0xff]   ;;  %1076 = vmatprep.subr.bf16.mxu0 %v1200_v0  ;;  %v1205_v7 = vld [vmem:[%s1624_s2 + $0xf0] sm:$0xff]   ;;  %v1209_v11 = vld [vmem:[%s1624_s2 + $0xe8] sm:$0xff]  }
   0x3   :  { %v1202_v3 = vld [vmem:[%s1624_s2 + $0x38] sm:$0xff]   ;;  %1098 = vmatprep.subr.bf16.mxu1 %v1201_v1  ;;  %v1206_v8 = vld [vmem:[%s1624_s2 + $0x30] sm:$0xff]   ;;  %v1210_v12 = vld [vmem:[%s1624_s2 + $0x28] sm:$0xff]  }
   0x4   :  { %v1203_v5 = vld [vmem:[%s1624_s2 + $0xb8] sm:$0xff]   ;;  %1077 = vmatpush3.bf16.msra.mxu0 %v1202_v3  ;;  %v1207_v9 = vld [vmem:[%s1624_s2 + $0xb0] sm:$0xff]   ;;  %v1211_v13 = vld [vmem:[%s1624_s2 + $0xa8] sm:$0xff]  }
   0x5   :  { %1099 = vmatpush3.bf16.msra.mxu1 %v1203_v5  ;;  %1078 = vmatprep.subr.bf16.mxu0 %v1204_v6  ;;  %v1212_v14 = vld [vmem:[%s1624_s2 + $0x60] sm:$0xff]   ;;  %v1216_v18 = vld [vmem:[%s1624_s2 + $0x58] sm:$0xff]   ;;  %v1220_v22 = vld [vmem:[%s1624_s2 + $0x50] sm:$0xff]  }
   0x6   :  { %1100 = vmatprep.subr.bf16.mxu1 %v1205_v7  ;;  %v1213_v15 = vld [vmem:[%s1624_s2 + $0xe0] sm:$0xff]   ;;  %v1217_v19 = vld [vmem:[%s1624_s2 + $0xd8] sm:$0xff]   ;;  %v1221_v23 = vld [vmem:[%s1624_s2 + $0xd0] sm:$0xff]  }
   0x7   :  { %v1214_v16 = vld [vmem:[%s1624_s2 + $0x20] sm:$0xff]   ;;  %v1218_v20 = vld [vmem:[%s1624_s2 + $0x18] sm:$0xff]   ;;  %v1222_v24 = vld [vmem:[%s1624_s2 + $0x10] sm:$0xff]  }
   0x8   :  { %1079 = vmatpush3.bf16.msra.mxu0 %v1206_v8  ;;  %v1215_v17 = vld [vmem:[%s1624_s2 + $0xa0] sm:$0xff]   ;;  %v1219_v21 = vld [vmem:[%s1624_s2 + $0x98] sm:$0xff]   ;;  %v1223_v25 = vld [vmem:[%s1624_s2 + $0x90] sm:$0xff]  }
   0x9   :  { %1101 = vmatpush3.bf16.msra.mxu1 %v1207_v9  ;;  %1080 = vmatprep.subr.bf16.mxu0 %v1208_v10  ;;  %v1224_v26 = vld [vmem:[%s1624_s2 + $0x48] sm:$0xff]   ;;  %v1228_v30 = vld [vmem:[%s1624_s2 + $0x40] sm:$0xff]   ;;  %v37_v36 = vld [vmem:[%s1622_s0 + $0x18] sm:$0xff] }
   0xa   :  { %1102 = vmatprep.subr.bf16.mxu1 %v1209_v11  ;;  %v1225_v27 = vld [vmem:[%s1624_s2 + $0xc8] sm:$0xff]   ;;  %v1229_v31 = vld [vmem:[%s1624_s2 + $0xc0] sm:$0xff]   ;;  %v45_v38 = vld [vmem:[%s1622_s0 + $0x58] sm:$0xff] }
   0xb   :  { %v1226_v28 = vld [vmem:[%s1624_s2 + $0x8] sm:$0xff]   ;;  %v1230_v32 = vld [vmem:[%s1624_s2] sm:$0xff]   ;;  %v53_v41 = vpack.c.bf16 %v45_v38, %v37_v36  ;;  %v36_v43 = vld [vmem:[%s1622_s0 + $0x10] sm:$0xff] }
   0xc   :  { %1081 = vmatpush3.bf16.msra.mxu0 %v1210_v12  ;;  %v1227_v29 = vld [vmem:[%s1624_s2 + $0x88] sm:$0xff]   ;;  %v1231_v33 = vld [vmem:[%s1624_s2 + $0x80] sm:$0xff]   ;;  %v44_v44 = vld [vmem:[%s1622_s0 + $0x50] sm:$0xff] }
   0xd   :  { %1103 = vmatpush3.bf16.msra.mxu1 %v1211_v13  ;;  %1082 = vmatprep.subr.bf16.mxu0 %v1212_v14  ;;  %v35_v34 = vld [vmem:[%s1622_s0 + $0x8] sm:$0xff]  ;;  %v34_v39 = vld [vmem:[%s1622_s0] sm:$0xff]  ;;  %v52_v45 = vpack.c.bf16 %v44_v44, %v36_v43  ;;  %v1232_v46 = vld [vmem:[%s1624_s2 + $0x178] sm:$0xff]  }
   0xe   :  { %1104 = vmatprep.subr.bf16.mxu1 %v1213_v15  ;;  %v43_v35 = vld [vmem:[%s1622_s0 + $0x48] sm:$0xff]  ;;  %v42_v40 = vld [vmem:[%s1622_s0 + $0x40] sm:$0xff]  ;;  %650 = vmatprep.mubr.bf16.mxu1 %v53_v41  ;;  %v1233_v47 = vld [vmem:[%s1624_s2 + $0x1f8] sm:$0xff]  }
   0xf   :  { %v51_v37 = vpack.c.bf16 %v43_v35, %v35_v34  ;;  %v50_v42 = vpack.c.bf16 %v42_v40, %v34_v39  ;;  %v1234_v48 = vld [vmem:[%s1624_s2 + $0x138] sm:$0xff]   ;;  %v1236_v50 = vld [vmem:[%s1624_s2 + $0x170] sm:$0xff]   ;;  %v1240_v54 = vld [vmem:[%s1624_s2 + $0x168] sm:$0xff]  }
  0x10   :  { %1083 = vmatpush3.bf16.msra.mxu0 %v1214_v16  ;;  %v1235_v49 = vld [vmem:[%s1624_s2 + $0x1b8] sm:$0xff]   ;;  %v1237_v51 = vld [vmem:[%s1624_s2 + $0x1f0] sm:$0xff]   ;;  %v1241_v55 = vld [vmem:[%s1624_s2 + $0x1e8] sm:$0xff]  }
  0x11   :  { %1105 = vmatpush3.bf16.msra.mxu1 %v1215_v17  ;;  %1084 = vmatprep.subr.bf16.mxu0 %v1216_v18  ;;  %v1238_v52 = vld [vmem:[%s1624_s2 + $0x130] sm:$0xff]   ;;  %v1242_v56 = vld [vmem:[%s1624_s2 + $0x128] sm:$0xff]   ;;  %v1244_v58 = vld [vmem:[%s1624_s2 + $0x160] sm:$0xff]  }
  0x12   :  { %1106 = vmatprep.subr.bf16.mxu1 %v1217_v19  ;;  %609 = vmatprep.mubr.bf16.mxu0 %v51_v37  ;;  %v1239_v53 = vld [vmem:[%s1624_s2 + $0x1b0] sm:$0xff]   ;;  %v1243_v57 = vld [vmem:[%s1624_s2 + $0x1a8] sm:$0xff]   ;;  %v1245_v59 = vld [vmem:[%s1624_s2 + $0x1e0] sm:$0xff]  }
  0x13   :  { %v1246_v60 = vld [vmem:[%s1624_s2 + $0x120] sm:$0xff]   ;;  %v1248_v62 = vld [vmem:[%s1624_s2 + $0x158] sm:$0xff]   ;;  %v1252_v2 = vld [vmem:[%s1624_s2 + $0x150] sm:$0xff]  }
  0x14   :  { %1085 = vmatpush3.bf16.msra.mxu0 %v1218_v20  ;;  %v1247_v61 = vld [vmem:[%s1624_s2 + $0x1a0] sm:$0xff]   ;;  %v1249_v63 = vld [vmem:[%s1624_s2 + $0x1d8] sm:$0xff]   ;;  %v1253_v3 = vld [vmem:[%s1624_s2 + $0x1d0] sm:$0xff]  }
  0x15   :  { %1107 = vmatpush3.bf16.msra.mxu1 %v1219_v21  ;;  %1086 = vmatprep.subr.bf16.mxu0 %v1220_v22  ;;  %v1250_v0 = vld [vmem:[%s1624_s2 + $0x118] sm:$0xff]   ;;  %v1254_v5 = vld [vmem:[%s1624_s2 + $0x110] sm:$0xff]   ;;  %v1256_v7 = vld [vmem:[%s1624_s2 + $0x148] sm:$0xff]  }
  0x16   :  { %1108 = vmatprep.subr.bf16.mxu1 %v1221_v23  ;;  %v1251_v1 = vld [vmem:[%s1624_s2 + $0x198] sm:$0xff]   ;;  %v1255_v6 = vld [vmem:[%s1624_s2 + $0x190] sm:$0xff]   ;;  %v1257_v8 = vld [vmem:[%s1624_s2 + $0x1c8] sm:$0xff]  }
  0x17   :  { %v1258_v9 = vld [vmem:[%s1624_s2 + $0x108] sm:$0xff]   ;;  %v1260_v11 = vld [vmem:[%s1624_s2 + $0x140] sm:$0xff]   ;;  %v41_v17 = vld [vmem:[%s1622_s0 + $0x38] sm:$0xff] }
  0x18   :  { %1087 = vmatpush3.bf16.msra.mxu0 %v1222_v24  ;;  %v1259_v10 = vld [vmem:[%s1624_s2 + $0x188] sm:$0xff]   ;;  %v1261_v12 = vld [vmem:[%s1624_s2 + $0x1c0] sm:$0xff]   ;;  %v49_v18 = vld [vmem:[%s1622_s0 + $0x78] sm:$0xff] }
  0x19   :  { %1109 = vmatpush3.bf16.msra.mxu1 %v1223_v25  ;;  %1088 = vmatprep.subr.bf16.mxu0 %v1224_v26  ;;  %v1262_v13 = vld [vmem:[%s1624_s2 + $0x100] sm:$0xff]   ;;  %v39_v15 = vld [vmem:[%s1622_s0 + $0x28] sm:$0xff]  ;;  %v57_v20 = vpack.c.bf16 %v49_v18, %v41_v17  ;;  %v40_v23 = vld [vmem:[%s1622_s0 + $0x30] sm:$0xff] }
  0x1a   :  { %1110 = vmatprep.subr.bf16.mxu1 %v1225_v27  ;;  %v1263_v14 = vld [vmem:[%s1624_s2 + $0x180] sm:$0xff]   ;;  %v47_v16 = vld [vmem:[%s1622_s0 + $0x68] sm:$0xff]  ;;  %v48_v25 = vld [vmem:[%s1622_s0 + $0x70] sm:$0xff] }
  0x1b   :  { %v55_v19 = vpack.c.bf16 %v47_v16, %v39_v15  ;;  %v38_v21 = vld [vmem:[%s1622_s0 + $0x20] sm:$0xff]  ;;  %v56_v27 = vpack.c.bf16 %v48_v25, %v40_v23 }
  0x1c   :  { %1089 = vmatpush3.bf16.msra.mxu0 %v1226_v28  ;;  %v46_v22 = vld [vmem:[%s1622_s0 + $0x60] sm:$0xff] }
  0x1d   :  { %1111 = vmatpush3.bf16.msra.mxu1 %v1227_v29  ;;  %1090 = vmatprep.subr.bf16.mxu0 %v1228_v30  ;;  %v54_v24 = vpack.c.bf16 %v46_v22, %v38_v21  ;;  %v743_v26 = vld [vmem:[%s1623_s1] sm:$0xff] }
  0x1e   :  { %1112 = vmatprep.subr.bf16.mxu1 %v1229_v31 }
  0x20   :  { %1091 = vmatpush3.bf16.msra.mxu0 %v1230_v32 }
  0x21   :  { %1113 = vmatpush3.bf16.msra.mxu1 %v1231_v33  ;;  %1120 = vmatprep.subr.bf16.mxu0 %v1232_v46 }
  0x22   :  { %1142 = vmatprep.subr.bf16.mxu1 %v1233_v47 }
  0x23   :  { %610 = vmatmul.mubr.bf16.vlgmr.msra.gmra.mxu0 %v50_v42 }
  0x24   :  { %651 = vmatmul.mubr.bf16.vlgmr.msra.gmra.mxu1 %v52_v45  ;;  %1121 = vmatpush3.bf16.msra.mxu0 %v1234_v48 }
  0x25   :  { %1143 = vmatpush3.bf16.msra.mxu1 %v1235_v49  ;;  %1122 = vmatprep.subr.bf16.mxu0 %v1236_v50 }
  0x26   :  { %1144 = vmatprep.subr.bf16.mxu1 %v1237_v51  ;;  %691 = vmatprep.mubr.bf16.mxu0 %v55_v19 }
  0x27   :  { %732 = vmatprep.mubr.bf16.mxu1 %v57_v20 }
  0x28   :  { %1123 = vmatpush3.bf16.msra.mxu0 %v1238_v52 }
  0x29   :  { %1145 = vmatpush3.bf16.msra.mxu1 %v1239_v53  ;;  %1124 = vmatprep.subr.bf16.mxu0 %v1240_v54 }
  0x2a   :  { %1146 = vmatprep.subr.bf16.mxu1 %v1241_v55 }
  0x2c   :  { %1125 = vmatpush3.bf16.msra.mxu0 %v1242_v56 }
  0x2d   :  { %1147 = vmatpush3.bf16.msra.mxu1 %v1243_v57  ;;  %1126 = vmatprep.subr.bf16.mxu0 %v1244_v58 }
  0x2e   :  { %1148 = vmatprep.subr.bf16.mxu1 %v1245_v59 }
  0x30   :  { %1127 = vmatpush3.bf16.msra.mxu0 %v1246_v60 }
  0x31   :  { %1149 = vmatpush3.bf16.msra.mxu1 %v1247_v61  ;;  %1128 = vmatprep.subr.bf16.mxu0 %v1248_v62 }
  0x32   :  { %1150 = vmatprep.subr.bf16.mxu1 %v1249_v63 }
  0x34   :  { %1129 = vmatpush3.bf16.msra.mxu0 %v1250_v0 }
  0x35   :  { %1151 = vmatpush3.bf16.msra.mxu1 %v1251_v1  ;;  %1130 = vmatprep.subr.bf16.mxu0 %v1252_v2 }
  0x36   :  { %1152 = vmatprep.subr.bf16.mxu1 %v1253_v3 }
  0x38   :  { %1131 = vmatpush3.bf16.msra.mxu0 %v1254_v5 }
  0x39   :  { %1153 = vmatpush3.bf16.msra.mxu1 %v1255_v6  ;;  %1132 = vmatprep.subr.bf16.mxu0 %v1256_v7 }
  0x3a   :  { %1154 = vmatprep.subr.bf16.mxu1 %v1257_v8 }
  0x3c   :  { %1133 = vmatpush3.bf16.msra.mxu0 %v1258_v9 }
  0x3d   :  { %1155 = vmatpush3.bf16.msra.mxu1 %v1259_v10  ;;  %1134 = vmatprep.subr.bf16.mxu0 %v1260_v11 }
  0x3e   :  { %1156 = vmatprep.subr.bf16.mxu1 %v1261_v12 }
  0x40   :  { %1135 = vmatpush3.bf16.msra.mxu0 %v1262_v13 }
  0x41   :  { %1157 = vmatpush3.bf16.msra.mxu1 %v1263_v14 }
  0x42   :  { %14 = vsyncpa [#allocation3], 0  ;;  %749 = vperm.xlu0 %1197, %v743_v26   ;;  %772 = vperm.xlu1 %1198, %v743_v26   ;;  %v744_v28 = vld [vmem:[%s1623_s1 + $0x8] sm:$0xff]  ;;  %v792_v30 = vld [vmem:[%s1628_s6 + $0x18] sm:$0xff]  ;;  %v757_v34 = vlaneseq  ;;  %vm795_vm0 = vcmask 130048   ;;  %vm877_vm1 = vcmask 261120  }
  0x43   :  { %692 = vmatmul.mubr.bf16.vlgmr.msra.gmra.mxu0 %v54_v24  ;;  %v794_v29 = vld [vmem:[%s1629_s7 + $0x8] sm:$0xff]  ;;  %v793_v31 = vld [vmem:[%s1629_s7] sm:$0xff]  ;;  %1181 = vmatprep.subr.mxu1 %v792_v30  ;;  %s1288_s16 = smov [#allocation2]  }
  0x44   :  { %733 = vmatmul.mubr.bf16.vlgmr.msra.gmra.mxu1 %v56_v27  ;;  %1174 = vmatprep.subr.mxu0 %v794_v29  ;;  %v790_v32 = vld [vmem:[%s1628_s6 + $0x8] sm:$0xff]  ;;  %v789_v33 = vld [vmem:[%s1628_s6] sm:$0xff]  ;;  %v758_v35 = vshrl.u32 %v757_v34, 7  ;;  %s985_s17 = sshll.u32 %s1288_s16, 4  ;;  %s986_s17 = int_to_ptr.vmem [resolvable:$true] %s985_s17 }
  0x45   :  { %1175 = vmatpush3.msra.mxu0 %v794_v29  ;;  %1182 = vmatpush3.msra.mxu1 %v792_v30  ;;  %v745_v37 = vld [vmem:[%s1626_s4] sm:$0x3]  ;;  %s1264_s18 = scalar_lea.vmem %s986_s17, 128  ;;  %p1269_p1 = scmp.lt.s32.totalorder %s986_s17, %s986_s17 }
  0x46   :  { %754 = vperm.xlu0 %1197, %v744_v28   ;;  %776 = vperm.xlu1 %1198, %v744_v28   ;;  %v759_v36 = vsub.s32 0, %v758_v35  ;;  %v781_v38 = vsub.s32 1, %v758_v35  ;;  %v1061_v41 = vld [vmem:[%s1627_s5] ss:$0 sm:$0xff]  ;;  %p1265_p0 = scmp.ne.s32.totalorder %s986_s17, %s1264_s18  ;;  %p1270_p2 = scmp.lt.s32.totalorder %s1264_s18, %s1264_s18 }
  0x47   :  { %1176 = vmatprep.subr.mxu0 %v793_v31  ;;  %v996_v63 = vld [vmem:[%s1625_s3] ss:$0 sm:$0xff] }
  0x48   :  { %1177 = vmatpush3.msra.mxu0 %v793_v31  ;;  %v760_v39 = vrot.slane %v745_v37, %v759_v36  ;;  %v782_v40 = vrot.slane %v745_v37, %v781_v38  ;;  %v1066_v30 = vld [vmem:[%s1630_s8] ss:$0 sm:$0xff]  ;;  %p1271_p3 = por %p1270_p2, %p1269_p1 }
  0x4a   :  { %1199 = vset.pattern.permute.xlu0 %v1287_v4  ;;  %v791_v4 = vld [vmem:[%s1628_s6 + $0x10] sm:$0xff]  ;;  %p1272_p4 = pnand %p1271_p3, %p1265_p0 }
  0x4b   :  { %1183 = vmatprep.subr.mxu1 %v791_v4 }
  0x4c   :  { %1184 = vmatpush3.msra.mxu1 %v791_v4 }
  0x4d   :  { %1185 = vmatprep.subr.mxu1 %v790_v32 }
  0x4e   :  { %1186 = vmatpush3.msra.mxu1 %v790_v32 }
  0x4f   :  { %1187 = vmatprep.subr.mxu1 %v789_v33 }
  0x50   :  { %1188 = vmatpush3.msra.mxu1 %v789_v33 }
  0xbd   :  { %v750_v42 = vpop.permute.xlu0 %749  ;;  %v773_v44 = vpop.permute.xlu1 %772 }
  0xbe   :  { %v761_v43 = vmul.f32 %v760_v39, %v750_v42  ;;  %v783_v45 = vmul.f32 %v782_v40, %v773_v44 }
  0xc0   :  { %v769_v46 = vadd.f32 %v1061_v41, %v761_v43 }
  0xc1   :  { %v755_v47 = vpop.permute.xlu0 %754  ;;  %v777_v50 = vpop.permute.xlu1 %776 }
  0xc2   :  { %v785_v48 = vadd.f32 %v783_v45, %v769_v46  ;;  %v762_v49 = vmul.f32 %v760_v39, %v755_v47  ;;  %v784_v51 = vmul.f32 %v782_v40, %v777_v50 }
  0xc4   :  { %v787_v52 = vmax.f32 %v785_v48, 0.0  ;;  %v770_v53 = vadd.f32 %v1061_v41, %v762_v49 }
  0xc6   :  { %v786_v54 = vadd.f32 %v784_v51, %v770_v53  ;;  %1178 = vmatprep.mubr.msk.f32.mxu0 %vm795_vm0, %v787_v52 }
  0xc8   :  { %v788_v55 = vmax.f32 %v786_v54, 0.0 }
  0xca   :  { %1179 = vmatmul.mubr.msk.f32.vlgmr.msra.gmra.mxu0 %vm795_vm0, %v788_v55 }
  0xe3   :  { %v1092_v56 = vpop.f32.mrf.mxu0 }
  0xe4   :  { %v1114_v57 = vpop.f32.mrf.mxu1 }
  0xe5   :  { %v1093_v58 = vpop.f32.mrf.mxu0 }
  0xe6   :  { %v1115_v59 = vpop.f32.mrf.mxu1  ;;  %v1094_v61 = vadd.f32 %v1093_v58, %v1092_v56 }
  0xe7   :  { %v1095_v60 = vpop.f32.mrf.mxu0  ;;  %v1116_v2 = vadd.f32 %v1115_v59, %v1114_v57 }
  0xe8   :  { %v1117_v62 = vpop.f32.mrf.mxu1  ;;  %v612_v1 = vadd.f32 %v1094_v61, %v996_v63 }
  0xe9   :  { %v1096_v0 = vpop.f32.mrf.mxu0 }
  0xea   :  { %v1097_v3 = vadd.f32 %v1096_v0, %v1095_v60  ;;  %v1118_v5 = vpop.f32.mrf.mxu1  ;;  %v653_v9 = vadd.f32 %v1116_v2, %v612_v1 }
  0xeb   :  { %v1119_v14 = vadd.f32 %v1118_v5, %v1117_v62 }
  0xec   :  { %v615_v10 = vadd.f32 %v1097_v3, %v996_v63 }
  0xee   :  { %v656_v19 = vadd.f32 %v1119_v14, %v615_v10 }
 0x103   :  { %v1136_v6 = vpop.f32.mrf.mxu0 }
 0x104   :  { %v1158_v7 = vpop.f32.mrf.mxu1 }
 0x105   :  { %v1137_v8 = vpop.f32.mrf.mxu0 }
 0x106   :  { %v1138_v11 = vadd.f32 %v1137_v8, %v1136_v6  ;;  %v1159_v12 = vpop.f32.mrf.mxu1 }
 0x107   :  { %v1139_v13 = vpop.f32.mrf.mxu0  ;;  %v1160_v16 = vadd.f32 %v1159_v12, %v1158_v7 }
 0x108   :  { %v694_v15 = vadd.f32 %v1138_v11, %v653_v9  ;;  %v1161_v17 = vpop.f32.mrf.mxu1 }
 0x109   :  { %v1140_v18 = vpop.f32.mrf.mxu0 }
 0x10a   :  { %v735_v20 = vadd.f32 %v1160_v16, %v694_v15  ;;  %v1141_v21 = vadd.f32 %v1140_v18, %v1139_v13  ;;  %v1162_v22 = vpop.f32.mrf.mxu1 }
 0x10b   :  { %v1163_v25 = vadd.f32 %v1162_v22, %v1161_v17 }
 0x10c   :  { %v741_v23 = vmax.f32 %v735_v20, 0.0  ;;  %v697_v24 = vadd.f32 %v1141_v21, %v656_v19 }
 0x10e   :  { %v738_v26 = vadd.f32 %v1163_v25, %v697_v24  ;;  %1189 = vmatprep.mubr.msk.f32.mxu1 %vm877_vm1, %v741_v23 }
 0x110   :  { %v742_v27 = vmax.f32 %v738_v26, 0.0 }
 0x112   :  { %1190 = vmatmul.mubr.msk.f32.vlgmr.msra.gmra.mxu1 %vm877_vm1, %v742_v27 }
 0x18a   :  { %v1180_v28 = vpop.f32.mrf.mxu0 }
 0x18c   :  { %v868_v4 = vpop.f32.mrf.mxu0 }
 0x1d2   :  { %v1191_v29 = vpop.f32.mrf.mxu1 }
 0x1d3   :  { %v956_v31 = vadd.f32 %v1191_v29, %v1180_v28 }
 0x1d4   :  { %v950_v32 = vpop.f32.mrf.mxu1 }
 0x1d5   :  { %v967_v33 = vadd.f32 %v1066_v30, %v956_v31  ;;  %v951_v34 = vadd.f32 %v950_v32, %v868_v4 }
 0x1d7   :  { %v966_v35 = vadd.f32 %v1066_v30, %v951_v34  ;;  %v969_v36 = vmax.f32 %v967_v33, 0.0 }
 0x1d9   :  { %v968_v37 = vmax.f32 %v966_v35, 0.0 }
 0x1db   :  { %v1074_v38 = vpack.c.bf16 %v969_v36, %v968_v37 }
 0x1dd   :  { %1075 = vst [vmem:[#allocation2] sm:$0xff] %v1074_v38  }
 0x1de   :  { %1275 = shalt.err (!%p1272_p4)
}
 0x1df   :  { %s1289_s8 = smov 64   ;;  %s1290_s19 = smov 4  }
 0x1e0   :  { %991 = dma.vmem_to_hbm [thread:$0]  %s986_s17, 128, %s1631_s9, [#allocation3], %s1289_s8, %s1289_s8, %s1290_s19  }
 0x1e1   :  { %1284 = dma.done.wait [#allocation3], 128  }
 0x1e2   :  { %1285 = vsyncadd [#allocation3], 4294967168 }
 0x1e3   :  { %995 = vsyncpa [#allocation3], 1 }

</bundles_post_ra>
